<compile_context>
chip_gen: v7x
topology: tpu7x:2x2x1
jax: 0.10.0
libtpu: 0.0.40
codegen_flags: <defaults>
</compile_context>

<pallas_src>
import functools

import jax
import jax.numpy as jnp
from jax.experimental import pallas as pl
from jax.experimental.pallas import tpu as pltpu

OUT_PAD = 128  # final layer padded to a lane-dense width; real logits are cols [:2]


def _round_up(x, m):
    return (x + m - 1) // m * m


def _elementwise_dtype():
    """bf16 bias-add/ReLU on chips with a bf16 VPU (v6e/v7x); f32 on v5e."""
    try:
        kind = jax.devices()[0].device_kind.lower()
    except Exception:  # pragma: no cover - non-TPU fallback
        return jnp.float32
    return jnp.float32 if "v5" in kind else jnp.bfloat16


def _mlp_kernel(x_ref,
                w1_ref, b1_ref,
                w2_ref, b2_ref,
                w3_ref, b3_ref,
                w4_ref, b4_ref,
                o_ref, *, elem_dtype):
    """Fused fc1->relu->fc2->relu->fc3->relu->fc4 for one (TB, in_dim) batch tile.

    Weights are bf16 MXU operands; accumulation is always f32. Bias-add/ReLU
    run in `elem_dtype` (bf16 on v6e/v7x, f32 on v5e).
    """
    h = x_ref[...].astype(jnp.bfloat16)  # (TB, in_dim)

    for w_ref, b_ref in ((w1_ref, b1_ref), (w2_ref, b2_ref), (w3_ref, b3_ref)):
        acc = jnp.dot(h, w_ref[...], preferred_element_type=jnp.float32) + b_ref[...]
        h = jnp.maximum(acc.astype(elem_dtype), 0).astype(jnp.bfloat16)
        # Dropout(0.5) -> identity in eval mode.

    out = jnp.dot(h, w4_ref[...], preferred_element_type=jnp.float32) + b4_ref[...]
    o_ref[...] = out.astype(o_ref.dtype)  # (TB, OUT_PAD) lane-dense bf16 store


@functools.partial(jax.jit, static_argnames=("tb",))
def news_classifier_forward(x, params, *, tb=1024):
    """x: [B, input_dim] f32. Returns [B, 2] f32 logits (eval-mode forward).

    tb: max batch tile (rounded to a multiple of 8). The actual tile is capped
        so the grid keeps >= 2 steps when the batch allows it (keeps both v7x
        TensorCores busy); the same large-tile default is fine on v5e/v6e.
    """
    B, in_dim = x.shape
    w1, b1 = params["fc1"]
    w2, b2 = params["fc2"]
    w3, b3 = params["fc3"]
    w4, b4 = params["fc4"]
    out_dim = w4.shape[1]

    # Pad the final layer to a lane-dense width (unmasked full-vreg stores).
    # Padding columns are exactly zero (zero weights + zero bias), so they
    # never leak into [:, :out_dim].
    w4p = jnp.pad(w4, ((0, 0), (0, OUT_PAD - out_dim)))
    b4p = jnp.pad(b4, ((0, 0), (0, OUT_PAD - out_dim)))

    # Batch tiling:
    #  * clamp tb to a sublane multiple (robustness),
    #  * cap TB so the grid has >= 2 steps whenever B allows it (v7x megacore),
    #  * ragged batches use Pallas partial-block handling -- no wrapper jnp.pad
    #    (which would re-stream all of x through HBM before the kernel).
    tb = max(8, (int(tb) // 8) * 8)
    TB = min(tb, _round_up(pl.cdiv(B, 2), 8))
    grid = (pl.cdiv(B, TB),)

    elem_dtype = _elementwise_dtype()

    def resident(arr):
        # Constant index_map -> fetched once, stays VMEM-resident across grid
        # steps; single buffer since it is never re-filled.
        return pl.BlockSpec(arr.shape, lambda i: (0, 0),
                            pipeline_mode=pl.Buffered(1))

    out = pl.pallas_call(
        functools.partial(_mlp_kernel, elem_dtype=elem_dtype),
        out_shape=jax.ShapeDtypeStruct((B, OUT_PAD), jnp.bfloat16),
        grid=grid,
        in_specs=[
            pl.BlockSpec((TB, in_dim), lambda i: (i, 0)),
            resident(w1), resident(b1),
            resident(w2), resident(b2),
            resident(w3), resident(b3),
            resident(w4p), resident(b4p),
        ],
        out_specs=pl.BlockSpec((TB, OUT_PAD), lambda i: (i, 0)),
        compiler_params=pltpu.CompilerParams(
            # Batch axis is embarrassingly parallel -> megacore sharding on v7x.
            dimension_semantics=("parallel",),
        ),
    )(x, w1, b1, w2, b2, w3, b3, w4p, b4p)

    return out[:, :out_dim].astype(jnp.float32)


def init_params(key, input_dim):
    """Matches nn.Linear's U(-1/sqrt(fan_in), 1/sqrt(fan_in)) init.

    Weights are stored [in_features, out_features] (transposed vs. PyTorch) in
    bfloat16 so the kernel computes `x @ W` directly on the MXU; biases stay f32.
    """
    dims = [(input_dim, 512), (512, 256), (256, 128), (128, 2)]
    names = ["fc1", "fc2", "fc3", "fc4"]
    params = {}
    for name, (fan_in, fan_out) in zip(names, dims):
        key, kw, kb = jax.random.split(key, 3)
        bound = 1.0 / float(fan_in) ** 0.5
        w = jax.random.uniform(kw, (fan_in, fan_out), jnp.float32, -bound, bound)
        b = jax.random.uniform(kb, (1, fan_out), jnp.float32, -bound, bound)
        params[name] = (w.astype(jnp.bfloat16), b)
    return params


def reference_forward(x, params):
    """Pure-JAX reference with the same numerics (bf16 operands, f32 accumulate)."""
    h = x
    for name in ("fc1", "fc2", "fc3"):
        w, b = params[name]
        h = jnp.maximum(
            jnp.dot(h.astype(jnp.bfloat16), w, preferred_element_type=jnp.float32) + b,
            0.0)
    w, b = params["fc4"]
    return jnp.dot(h.astype(jnp.bfloat16), w, preferred_element_type=jnp.float32) + b


if __name__ == "__main__":
    key = jax.random.PRNGKey(0)
    k_param, k_x = jax.random.split(key)

    batch = 20        # not a multiple of the tile -> exercises the partial final block
    input_dim = 32    # X_train.shape[1] stand-in

    params = init_params(k_param, input_dim)
    x = jax.random.normal(k_x, (batch, input_dim), jnp.float32)

    # Default tb=1024 -> TB=16 here (>=2 grid steps), grid=(2,), second block partial.
    out = news_classifier_forward(x, params)
    out = jax.block_until_ready(out)

    ref = reference_forward(x, params)
    assert out.shape == (batch, 2), out.shape
    assert jnp.allclose(out, ref, atol=1e-2, rtol=1e-2), "mismatch vs reference"

    print("KERNEL_OK")
</pallas_src>

<mosaic_0001>
module attributes {stable_mosaic.version = 11 : i64} {
  func.func @_mlp_kernel(%arg0: i32, %arg1: memref<16x32xf32, #tpu.memory_space<vmem>>, %arg2: memref<32x512xbf16, #tpu.memory_space<vmem>>, %arg3: memref<1x512xf32, #tpu.memory_space<vmem>>, %arg4: memref<512x256xbf16, #tpu.memory_space<vmem>>, %arg5: memref<1x256xf32, #tpu.memory_space<vmem>>, %arg6: memref<256x128xbf16, #tpu.memory_space<vmem>>, %arg7: memref<1x128xf32, #tpu.memory_space<vmem>>, %arg8: memref<128x128xbf16, #tpu.memory_space<vmem>>, %arg9: memref<1x128xf32, #tpu.memory_space<vmem>>, %arg10: memref<16x128xbf16, #tpu.memory_space<vmem>>) attributes {dimension_semantics = [#tpu.dimension_semantics<parallel>], iteration_bounds = array<i64: 2>, scalar_prefetch = 0 : i64, scratch_operands = 0 : i64, tpu.core_type = #tpu.core_type<tc>, window_params = [{transform_indices = @transform_0, window_bounds = array<i64: 16, 32>}, {pipeline_mode = #tpu.pipeline_mode<synchronous>, transform_indices = @transform_1, window_bounds = array<i64: 32, 512>}, {pipeline_mode = #tpu.pipeline_mode<synchronous>, transform_indices = @transform_2, window_bounds = array<i64: 1, 512>}, {pipeline_mode = #tpu.pipeline_mode<synchronous>, transform_indices = @transform_3, window_bounds = array<i64: 512, 256>}, {pipeline_mode = #tpu.pipeline_mode<synchronous>, transform_indices = @transform_4, window_bounds = array<i64: 1, 256>}, {pipeline_mode = #tpu.pipeline_mode<synchronous>, transform_indices = @transform_5, window_bounds = array<i64: 256, 128>}, {pipeline_mode = #tpu.pipeline_mode<synchronous>, transform_indices = @transform_6, window_bounds = array<i64: 1, 128>}, {pipeline_mode = #tpu.pipeline_mode<synchronous>, transform_indices = @transform_7, window_bounds = array<i64: 128, 128>}, {pipeline_mode = #tpu.pipeline_mode<synchronous>, transform_indices = @transform_8, window_bounds = array<i64: 1, 128>}, {transform_indices = @transform_9, window_bounds = array<i64: 16, 128>}]} {
    %c0 = arith.constant 0 : index
    %c0_0 = arith.constant 0 : index
    %0 = vector.load %arg1[%c0, %c0_0] : memref<16x32xf32, #tpu.memory_space<vmem>>, vector<16x32xf32>
    %1 = arith.truncf %0 : vector<16x32xf32> to vector<16x32xbf16>
    %c0_1 = arith.constant 0 : index
    %c0_2 = arith.constant 0 : index
    %2 = vector.load %arg2[%c0_1, %c0_2] : memref<32x512xbf16, #tpu.memory_space<vmem>>, vector<32x512xbf16>
    %cst = arith.constant dense<0.000000e+00> : vector<16x512xf32>
    %3 = tpu.matmul %1, %2, %cst {dimension_numbers = #tpu.dot_dimension_numbers<[1], [0], [0], [1], [0, 0, 1, 1], [], []>} : vector<16x32xbf16>, vector<32x512xbf16>, vector<16x512xf32> -> vector<16x512xf32>
    %c0_3 = arith.constant 0 : index
    %c0_4 = arith.constant 0 : index
    %4 = vector.load %arg3[%c0_3, %c0_4] : memref<1x512xf32, #tpu.memory_space<vmem>>, vector<1x512xf32>
    %5 = vector.broadcast %4 : vector<1x512xf32> to vector<16x512xf32>
    %6 = arith.addf %3, %5 : vector<16x512xf32>
    %7 = arith.truncf %6 : vector<16x512xf32> to vector<16x512xbf16>
    %cst_5 = arith.constant 0.000000e+00 : bf16
    %8 = vector.broadcast %cst_5 : bf16 to vector<16x512xbf16>
    %9 = arith.maximumf %7, %8 : vector<16x512xbf16>
    %c0_6 = arith.constant 0 : index
    %c0_7 = arith.constant 0 : index
    %10 = vector.load %arg4[%c0_6, %c0_7] : memref<512x256xbf16, #tpu.memory_space<vmem>>, vector<512x256xbf16>
    %cst_8 = arith.constant dense<0.000000e+00> : vector<16x256xf32>
    %11 = tpu.matmul %9, %10, %cst_8 {dimension_numbers = #tpu.dot_dimension_numbers<[1], [0], [0], [1], [0, 0, 1, 1], [], []>} : vector<16x512xbf16>, vector<512x256xbf16>, vector<16x256xf32> -> vector<16x256xf32>
    %c0_9 = arith.constant 0 : index
    %c0_10 = arith.constant 0 : index
    %12 = vector.load %arg5[%c0_9, %c0_10] : memref<1x256xf32, #tpu.memory_space<vmem>>, vector<1x256xf32>
    %13 = vector.broadcast %12 : vector<1x256xf32> to vector<16x256xf32>
    %14 = arith.addf %11, %13 : vector<16x256xf32>
    %15 = arith.truncf %14 : vector<16x256xf32> to vector<16x256xbf16>
    %cst_11 = arith.constant 0.000000e+00 : bf16
    %16 = vector.broadcast %cst_11 : bf16 to vector<16x256xbf16>
    %17 = arith.maximumf %15, %16 : vector<16x256xbf16>
    %c0_12 = arith.constant 0 : index
    %c0_13 = arith.constant 0 : index
    %18 = vector.load %arg6[%c0_12, %c0_13] : memref<256x128xbf16, #tpu.memory_space<vmem>>, vector<256x128xbf16>
    %cst_14 = arith.constant dense<0.000000e+00> : vector<16x128xf32>
    %19 = tpu.matmul %17, %18, %cst_14 {dimension_numbers = #tpu.dot_dimension_numbers<[1], [0], [0], [1], [0, 0, 1, 1], [], []>} : vector<16x256xbf16>, vector<256x128xbf16>, vector<16x128xf32> -> vector<16x128xf32>
    %c0_15 = arith.constant 0 : index
    %c0_16 = arith.constant 0 : index
    %20 = vector.load %arg7[%c0_15, %c0_16] : memref<1x128xf32, #tpu.memory_space<vmem>>, vector<1x128xf32>
    %21 = vector.broadcast %20 : vector<1x128xf32> to vector<16x128xf32>
    %22 = arith.addf %19, %21 : vector<16x128xf32>
    %23 = arith.truncf %22 : vector<16x128xf32> to vector<16x128xbf16>
    %cst_17 = arith.constant 0.000000e+00 : bf16
    %24 = vector.broadcast %cst_17 : bf16 to vector<16x128xbf16>
    %25 = arith.maximumf %23, %24 : vector<16x128xbf16>
    %c0_18 = arith.constant 0 : index
    %c0_19 = arith.constant 0 : index
    %26 = vector.load %arg8[%c0_18, %c0_19] : memref<128x128xbf16, #tpu.memory_space<vmem>>, vector<128x128xbf16>
    %cst_20 = arith.constant dense<0.000000e+00> : vector<16x128xf32>
    %27 = tpu.matmul %25, %26, %cst_20 {dimension_numbers = #tpu.dot_dimension_numbers<[1], [0], [0], [1], [0, 0, 1, 1], [], []>} : vector<16x128xbf16>, vector<128x128xbf16>, vector<16x128xf32> -> vector<16x128xf32>
    %c0_21 = arith.constant 0 : index
    %c0_22 = arith.constant 0 : index
    %28 = vector.load %arg9[%c0_21, %c0_22] : memref<1x128xf32, #tpu.memory_space<vmem>>, vector<1x128xf32>
    %29 = vector.broadcast %28 : vector<1x128xf32> to vector<16x128xf32>
    %30 = arith.addf %27, %29 : vector<16x128xf32>
    %31 = arith.truncf %30 : vector<16x128xf32> to vector<16x128xbf16>
    %c0_23 = arith.constant 0 : index
    %c0_24 = arith.constant 0 : index
    %32 = vector.load %arg10[%c0_23, %c0_24] : memref<16x128xbf16, #tpu.memory_space<vmem>>, vector<16x128xbf16>
    tpu.vector_store %arg10[%c0_23, %c0_24], %31 {strides = array<i32>} : memref<16x128xbf16, #tpu.memory_space<vmem>>, vector<16x128xbf16>,
    return
  }
  func.func @transform_0(%arg0: i32) -> (i32, i32) {
    %c0_i32 = arith.constant 0 : i32
    %c0_i32_0 = arith.constant 0 : i32
    return %arg0, %c0_i32 : i32, i32
  }
  func.func @transform_1(%arg0: i32) -> (i32, i32) {
    %c0_i32 = arith.constant 0 : i32
    %c0_i32_0 = arith.constant 0 : i32
    %c0_i32_1 = arith.constant 0 : i32
    return %c0_i32, %c0_i32_0 : i32, i32
  }
  func.func @transform_2(%arg0: i32) -> (i32, i32) {
    %c0_i32 = arith.constant 0 : i32
    %c0_i32_0 = arith.constant 0 : i32
    %c0_i32_1 = arith.constant 0 : i32
    return %c0_i32, %c0_i32_0 : i32, i32
  }
  func.func @transform_3(%arg0: i32) -> (i32, i32) {
    %c0_i32 = arith.constant 0 : i32
    %c0_i32_0 = arith.constant 0 : i32
    %c0_i32_1 = arith.constant 0 : i32
    return %c0_i32, %c0_i32_0 : i32, i32
  }
  func.func @transform_4(%arg0: i32) -> (i32, i32) {
    %c0_i32 = arith.constant 0 : i32
    %c0_i32_0 = arith.constant 0 : i32
    %c0_i32_1 = arith.constant 0 : i32
    return %c0_i32, %c0_i32_0 : i32, i32
  }
  func.func @transform_5(%arg0: i32) -> (i32, i32) {
    %c0_i32 = arith.constant 0 : i32
    %c0_i32_0 = arith.constant 0 : i32
    %c0_i32_1 = arith.constant 0 : i32
    return %c0_i32, %c0_i32_0 : i32, i32
  }
  func.func @transform_6(%arg0: i32) -> (i32, i32) {
    %c0_i32 = arith.constant 0 : i32
    %c0_i32_0 = arith.constant 0 : i32
    %c0_i32_1 = arith.constant 0 : i32
    return %c0_i32, %c0_i32_0 : i32, i32
  }
  func.func @transform_7(%arg0: i32) -> (i32, i32) {
    %c0_i32 = arith.constant 0 : i32
    %c0_i32_0 = arith.constant 0 : i32
    %c0_i32_1 = arith.constant 0 : i32
    return %c0_i32, %c0_i32_0 : i32, i32
  }
  func.func @transform_8(%arg0: i32) -> (i32, i32) {
    %c0_i32 = arith.constant 0 : i32
    %c0_i32_0 = arith.constant 0 : i32
    %c0_i32_1 = arith.constant 0 : i32
    return %c0_i32, %c0_i32_0 : i32, i32
  }
  func.func @transform_9(%arg0: i32) -> (i32, i32) {
    %c0_i32 = arith.constant 0 : i32
    %c0_i32_0 = arith.constant 0 : i32
    return %arg0, %c0_i32 : i32, i32
  }
}

</mosaic_0001>

<bundles_post_ra>
// kernel: news_classifier_forward.1
= control target key start
LH: loop header
LB: loop body
LE: loop exit
PB: predicated region body
PF: predicated region fallthrough
CT: control target
= control target key end

     0   :  { %14 = vsyncpa [#allocation3], 0  ;;  %s2572_s0 = inlined_call_operand.hbm [shape: f32[20,32], index: 0, kind: input, shape index: {}]   ;;  %s2573_s1 = inlined_call_operand.vmem [shape: bf16[32,512], index: 1, kind: input, shape index: {}]   ;;  %s2574_s2 = inlined_call_operand.vmem [shape: f32[1,512], index: 2, kind: input, shape index: {}]   ;;  %s2575_s3 = inlined_call_operand.hbm [shape: bf16[512,256], index: 3, kind: input, shape index: {}]   ;;  %s2576_s4 = inlined_call_operand.vmem [shape: f32[1,256], index: 4, kind: input, shape index: {}]   ;;  %s2577_s5 = inlined_call_operand.vmem [shape: bf16[256,128], index: 5, kind: input, shape index: {}]   ;;  %s2578_s6 = inlined_call_operand.vmem [shape: f32[1,128], index: 6, kind: input, shape index: {}]   ;;  %s2579_s7 = inlined_call_operand.vmem [shape: bf16[128,128], index: 7, kind: input, shape index: {}]   ;;  %s2580_s8 = inlined_call_operand.vmem [shape: f32[1,128], index: 8, kind: input, shape index: {}]   ;;  %s2581_s9 = inlined_call_operand.vmem [shape: bf16[20,128], index: 9, kind: output, shape index: {}]  }
   0x1   :  { %16 = vsyncpa [#allocation3 + $0x1], 0 }
   0x2   :  { %17 = vsyncpa [#allocation5], 0  ;;  %s2245_s30 = smov 0   ;;  %s2247_s10 = smov 0  }
   0x3   :  { %s2249_s11 = smov 0   ;;  %s2251_s12 = smov 0  }
   0x4 LB: > { %s2264_s13 = sadd.s32 4294967295, %s2152_s12   ;;  %s2267_s14 = sadd.s32 1, %s2152_s12   ;;  %s2152_s12 = sphi %s2251_s12, %s2599_s12   ;;  %s2148_s11 = sphi %s2249_s11, %s2598_s11   ;;  %s2144_s10 = sphi %s2247_s10, %s2597_s10   ;;  %s2140_s30 = sphi %s2245_s30, %s2596_s30  }
   0x5   : > { %s27_s15 = ssub.s32 %s2152_s12, %s2267_s14  ;;  %s30_s16 = sadd.s32 1, %s2148_s11 }
   0x6   : > { %p28_p0 = scmp.eq.s32.totalorder %s27_s15, 0  ;;  %p37_p1 = scmp.ne.s32.totalorder %s2148_s11, %s2144_s10 }
   0x7   : > { %p38_p2 = scmp.eq.s32.totalorder %s2152_s12, 0  ;;  %p43_p3 = scmp.ne.s32.totalorder %s2144_s10, %s2140_s30 }
   0x8   : > { %s2277_s17 = scalar_select %p28_p0, %s2148_s11, %s30_s16  }
   0x9   : > { %p2279_p4 = por %p38_p2, %p37_p1  ;;  %p2582_p5 = scmp.eq.s32.totalorder %s2264_s13, 0 }
   0xa   : > { %p235_p6 = scmp.eq.s32.totalorder %s2264_s13, 1  ;;  %p1576_p7 = scmp.ge.s32.totalorder %s2152_s12, 1 }
   0xb   : > { %s2585_s18 = scalar_select %p2279_p4, 1, 0 }
   0xc   : > { %p2288_p8 = por %p2582_p5, %p43_p3  ;;  %p248_p9 = scmp.lt.s32.totalorder %s2152_s12, 3 }
   0xd   : > { %p2293_p10 = por %p235_p6, %p37_p1  ;;  %s2186_s22 = smov [#allocation4]  }
   0xe   : > { %s2586_s19 = scalar_select %p2288_p8, 1, 0 }
   0xf   : > { %s2587_s20 = scalar_select %p2293_p10, 1, 0 }
  0x10   : > { %p2297_p11 = pnand %p1576_p7, %p248_p9  ;;  %s266_s23 = sshll.u32 %s2186_s22, 4  ;;  %s267_s23 = int_to_ptr.vmem [resolvable:$true] %s266_s23 }
  0x11   : > { %s2026_s27 = scalar_lea.hbm %s2575_s3, 8192 }
  0x12   : > { %s2588_s21 = scalar_select %p2297_p11, 1, 0 }
  0x13   : > { %p1784_p12 = pneg %p2297_p11  ;;  %p2027_p0 = scmp.ne.s32.totalorder %s2575_s3, %s2026_s27 }
  0x14   : > { %p2033_p6 = scmp.lt.u32.totalorder %s2026_s27, %s2575_s3 }
  0x15   : > { %p2305_p13 = pnand %p1784_p12, %p2582_p5 }
  0x17   : > { %p2028_p1 = pneg %p2305_p13 }
  0x19   : > { %p2029_p2 = pnand %p2028_p1, %p2027_p0 }
  0x1b   : > { %p2030_p3 = pneg %p2029_p2 }
  0x1d   : > { %p2035_p7 = pnand %p2033_p6, %p2030_p3 }
  0x1f   : > { %2038 = shalt.err (!%p2035_p7)
}
  0x20   : > { %s2039_s16 = scalar_lea.vmem %s267_s23, 8192  ;;  %p2047_p10 = scmp.lt.s32.totalorder %s267_s23, %s267_s23 }
  0x21   : > { %p2040_p9 = scmp.ne.s32.totalorder %s267_s23, %s2039_s16  ;;  %p2048_p8 = scmp.lt.s32.totalorder %s2039_s16, %s2039_s16 }
  0x23   : > { %p2042_p12 = pnand %p2040_p9, %p2028_p1  ;;  %p2049_p11 = por %p2048_p8, %p2047_p10 }
  0x25   : > { %p2043_p5 = pneg %p2042_p12 }
  0x27   : > { %p2050_p4 = pnand %p2049_p11, %p2043_p5 }
  0x29   : > { %2053 = shalt.err (!%p2050_p4)
}
  0x2a   : > { %s2187_s22 = smov 128   ;;  %s2188_s25 = smov 8  }
  0x2b   : > { %1787 = dma.hbm_to_vmem [thread:$0]  (!%p2305_p13), %s2575_s3, 8192, %s267_s23, [#allocation5], %s2187_s22, %s2187_s22, %s2188_s25  }
  0x2c   : > { %p1578_p0 = scmp.ge.s32.totalorder %s2152_s12, 2 }
  0x2d   : > { %p2590_p2 = scmp.ne.s32.totalorder (!%p1578_p0), %s2585_s18, 0 }
  0x2e   : > { %291 = sbr.rel (%p1578_p0) target bundleno = 88 (0x58), region = 48 }
  0x35   : > { %294 = sbr.rel (!%p2590_p2) target bundleno = 88 (0x58), region = 52  ;;  %s295_s27 = sand.u32 (%p2590_p2), 1, %s2148_s11  }
  0x36   : > { %s1580_s29 = sshll.u32 (%p2590_p2), %s2152_s12, 1  ;;  %s1579_s30 = sshll.u32 (%p2590_p2), %s295_s27, 4 }
  0x37   : > { %s301_s15 = ssub.s32 (%p2590_p2), 3, %s1580_s29  ;;  %s2333_s26 = scalar_lea.sflag (%p2590_p2), [#allocation3], %s295_s27 }
  0x38   : > { %p302_p4 = scmp.lt.s32.totalorder (%p2590_p2), %s301_s15, 2  ;;  %s299_s23 = scalar_lea.vmem (%p2590_p2), [#allocation2], %s1579_s30 }
  0x3c   : > { %s2601_s15 = smov (!%p302_p4, %s301_s15), 2 }
  0x3d   : > { %s2330_s16 = sshll.u32 %s2601_s15, 7 }
  0x3e   : > { %s306_s24 = ssub.s32 256, %s2330_s16 }
  0x3f   : > { %307 = vsyncadd %s2333_s26, %s306_s24  ;;  %p1582_p5 = scmp.ne.s32.totalorder %s2330_s16, 0  ;;  %s1709_s18 = sshll.u32 %s2152_s12, 8 }
  0x40   : > { %s2341_s28 = scalar_lea.hbm %s2572_s0, %s1709_s18  ;;  %s312_s27 = sshll.u32 %s299_s23, 4  ;;  %s2343_s27 = int_to_ptr.vmem [resolvable:$true] %s312_s27 }
  0x41   : > { %s2054_s29 = scalar_lea.hbm %s2341_s28, %s2330_s16  ;;  %s2058_s12 = scalar_lea.hbm %s2572_s0, 384 }
  0x42   : > { %p2055_p8 = scmp.ne.s32.totalorder %s2341_s28, %s2054_s29  ;;  %p2059_p13 = scmp.lt.u32.totalorder %s2341_s28, %s2572_s0 }
  0x43   : > { %p2060_p1 = scmp.lt.u32.totalorder %s2058_s12, %s2054_s29  ;;  %p2062_p6 = scmp.lt.u32.totalorder %s2054_s29, %s2341_s28 }
  0x44   : > { %p2056_p10 = pnand %p2055_p8, %p1582_p5 }
  0x45   : > { %p2061_p3 = por %p2060_p1, %p2059_p13 }
  0x46   : > { %p2057_p11 = pneg %p2056_p10 }
  0x47   : > { %p2063_p7 = por %p2062_p6, %p2061_p3 }
  0x49   : > { %p2064_p9 = pnand %p2063_p7, %p2057_p11 }
  0x4b   : > { %2067 = shalt.err (!%p2064_p9)
}
  0x4c   : > { %s2068_s23 = scalar_lea.vmem %s2343_s27, %s2330_s16  ;;  %s2189_s18 = smov [#allocation2]  }
  0x4d   : > { %p2069_p12 = scmp.ne.s32.totalorder %s2343_s27, %s2068_s23  ;;  %s2072_s25 = sshll.u32 %s2189_s18, 4  ;;  %s2073_s25 = int_to_ptr.vmem [resolvable:$false] %s2072_s25 }
  0x4e   : > { %s2074_s30 = scalar_lea.vmem %s2073_s25, 512  ;;  %p2075_p4 = scmp.lt.s32.totalorder %s2343_s27, %s2073_s25 }
  0x4f   : > { %p2070_p0 = pnand %p2069_p12, %p1582_p5  ;;  %p2076_p8 = scmp.lt.s32.totalorder %s2074_s30, %s2068_s23 }
  0x51   : > { %p2071_p2 = pneg %p2070_p0  ;;  %p2077_p10 = por %p2076_p8, %p2075_p4 }
  0x53   : > { %p2078_p13 = pnand %p2077_p10, %p2071_p2 }
  0x55   : > { %2081 = shalt.err (!%p2078_p13)
}
  0x56   : > { %s2190_s29 = smov 128   ;;  %s2191_s15 = smov 8  }
  0x57   : > { %318 = dma.hbm_to_vmem [thread:$0]  (%p1582_p5), %s2341_s28, %s2330_s16, %s2343_s27, %s2333_s26, %s2190_s29, %s2190_s29, %s2191_s15  }
  0x58 PF: > { %p2591_p11 = scmp.ne.s32.totalorder %s2588_s21, 0 }
  0x59   : > { %s2373_s12 = sand.u32 (!%p2591_p11), 1, %s2144_s10   ;;  %p2592_p1 = scmp.ne.s32.totalorder (!%p2591_p11), %s2586_s19, 0 }
  0x5a   : > { %324 = sbr.rel (%p2591_p11) target bundleno = 1109 (0x455), region = 56  ;;  %s1587_s24 = sshll.u32 (!%p2591_p11), %s2373_s12, 4 }
  0x5b   : > { %s327_s22 = scalar_lea.sflag (!%p2591_p11), [#allocation3], %s2373_s12  ;;  %s330_s23 = scalar_lea.vmem (!%p2591_p11), [#allocation2], %s1587_s24 }
  0x61   : > { %2131 = dma.done.wait (%p2592_p1), %s327_s22, 256  }
  0x62   : > { %2133 = vsyncadd (%p2592_p1), %s327_s22, 4294967040  ;;  %p2593_p5 = scmp.eq.s32.totalorder %s2264_s13, 0 }
  0x64   : > { %2135 = dma.done.wait (%p2593_p5), [#allocation5], 8192   ;;  %p2594_p3 = pmov %p2593_p5 }
  0x65   : > { %v2192_v0 = vmov 0   ;;  %v1894_v1 = vld [vmem:[%s2573_s1 + $0x4] ss:$16 sps:$4 sm:$0xff]   ;;  %v1896_v2 = vld [vmem:[%s2573_s1] ss:$16 sps:$4 sm:$0xff]   ;;  %v380_v6 = vld [vmem:[%s330_s23 + $0x8] sm:$0xff]  ;;  %v392_v56 = vlaneseq }
  0x66   : > { %2137 = vsyncadd (%p2594_p3), [#allocation5], 4294959104  ;;  %488 = vmatprep.mubr.bf16.mxu1 %v2192_v0  ;;  %456 = vmatprep.subr.bf16.mxu1 %v1894_v1  ;;  %v1897_v3 = vld [vmem:[%s2573_s1 + $0x24] ss:$16 sps:$4 sm:$0xff]   ;;  %v1899_v4 = vld [vmem:[%s2573_s1 + $0x20] ss:$16 sps:$4 sm:$0xff]  }
  0x67   : > { %v379_v5 = vld [vmem:[%s330_s23] sm:$0xff]  ;;  %457 = vmatpush1.bf16.msra.mxu1 %v1896_v2  ;;  %v1902_v7 = vld [vmem:[%s2573_s1 + $0xc] ss:$16 sps:$4 sm:$0xff]   ;;  %v1900_v8 = vld [vmem:[%s2573_s1 + $0x8] ss:$16 sps:$4 sm:$0xff]   ;;  %vm452_vm0 = vcmask 261120  }
  0x68   : > { %458 = vmatprep.subr.bf16.mxu1 %v1897_v3  ;;  %v381_v9 = vpack.c.bf16 %v380_v6, %v379_v5  ;;  %v1906_v10 = vld [vmem:[#allocation4 + $0x4] ss:$8 sps:$4 sm:$0xff]   ;;  %v1908_v11 = vld [vmem:[#allocation4] ss:$8 sps:$4 sm:$0xff]   ;;  %v1909_v13 = vld [vmem:[#allocation4 + $0x14] ss:$8 sps:$4 sm:$0xff]  }
  0x69   : > { %v1905_v12 = vld [vmem:[%s2573_s1 + $0x2c] ss:$16 sps:$4 sm:$0xff]   ;;  %946 = vmatprep.subr.bf16.mxu0 %v1906_v10  ;;  %v1911_v14 = vld [vmem:[#allocation4 + $0x10] ss:$8 sps:$4 sm:$0xff]   ;;  %v1914_v17 = vld [vmem:[#allocation4 + $0x20] ss:$8 sps:$4 sm:$0xff]  }
  0x6a   : > { %947 = vmatpush1.bf16.msra.mxu0 %v1908_v11  ;;  %v1912_v15 = vld [vmem:[#allocation4 + $0x24] ss:$8 sps:$4 sm:$0xff]   ;;  %v1903_v16 = vld [vmem:[%s2573_s1 + $0x28] ss:$16 sps:$4 sm:$0xff]   ;;  %v1915_v18 = vld [vmem:[#allocation4 + $0x34] ss:$8 sps:$4 sm:$0xff]  }
  0x6b   : > { %459 = vmatpush1.bf16.msra.mxu1 %v1899_v4  ;;  %948 = vmatprep.subr.bf16.mxu0 %v1909_v13  ;;  %v1917_v19 = vld [vmem:[#allocation4 + $0x30] ss:$8 sps:$4 sm:$0xff]   ;;  %v1918_v20 = vld [vmem:[#allocation4 + $0x44] ss:$8 sps:$4 sm:$0xff]   ;;  %v1920_v21 = vld [vmem:[#allocation4 + $0x40] ss:$8 sps:$4 sm:$0xff]  }
  0x6c   : > { %499 = vmatprep.subr.bf16.mxu1 %v1902_v7  ;;  %v1921_v22 = vld [vmem:[#allocation4 + $0x54] ss:$8 sps:$4 sm:$0xff]   ;;  %v1923_v23 = vld [vmem:[#allocation4 + $0x50] ss:$8 sps:$4 sm:$0xff]   ;;  %v1924_v24 = vld [vmem:[#allocation4 + $0x64] ss:$8 sps:$4 sm:$0xff]  }
  0x6d   : > { %v1926_v25 = vld [vmem:[#allocation4 + $0x60] ss:$8 sps:$4 sm:$0xff]   ;;  %v1927_v26 = vld [vmem:[#allocation4 + $0x74] ss:$8 sps:$4 sm:$0xff]   ;;  %v1929_v27 = vld [vmem:[#allocation4 + $0x70] ss:$8 sps:$4 sm:$0xff]  }
  0x6e   : > { %1598 = vmatmul.mubr.msk.bf16.vlgmr.msra.gmra.mrb[0].mxu1 %vm452_vm0, %v381_v9  ;;  %949 = vmatpush1.bf16.msra.mxu0 %v1911_v14  ;;  %v1930_v28 = vld [vmem:[#allocation4 + $0x84] ss:$8 sps:$4 sm:$0xff]   ;;  %v1932_v29 = vld [vmem:[#allocation4 + $0x80] ss:$8 sps:$4 sm:$0xff]   ;;  %v1933_v30 = vld [vmem:[#allocation4 + $0x94] ss:$8 sps:$4 sm:$0xff]  }
  0x6f   : > { %500 = vmatpush1.bf16.msra.mxu1 %v1900_v8  ;;  %531 = vmatprep.mubr.bf16.mxu1 %v2192_v0  ;;  %v1935_v31 = vld [vmem:[#allocation4 + $0x90] ss:$8 sps:$4 sm:$0xff]   ;;  %v1936_v32 = vld [vmem:[#allocation4 + $0xa4] ss:$8 sps:$4 sm:$0xff]   ;;  %v1938_v33 = vld [vmem:[#allocation4 + $0xa0] ss:$8 sps:$4 sm:$0xff]  }
  0x70   : > { %501 = vmatprep.subr.bf16.mxu1 %v1905_v12  ;;  %950 = vmatprep.subr.bf16.mxu0 %v1912_v15  ;;  %v1939_v34 = vld [vmem:[#allocation4 + $0xb4] ss:$8 sps:$4 sm:$0xff]   ;;  %v1941_v35 = vld [vmem:[#allocation4 + $0xb0] ss:$8 sps:$4 sm:$0xff]   ;;  %v1942_v36 = vld [vmem:[#allocation4 + $0xc4] ss:$8 sps:$4 sm:$0xff]  }
  0x71   : > { %v1944_v37 = vld [vmem:[#allocation4 + $0xc0] ss:$8 sps:$4 sm:$0xff]   ;;  %v1945_v38 = vld [vmem:[#allocation4 + $0xd4] ss:$8 sps:$4 sm:$0xff]   ;;  %v1947_v39 = vld [vmem:[#allocation4 + $0xd0] ss:$8 sps:$4 sm:$0xff]  }
  0x72   : > { %951 = vmatpush1.bf16.msra.mxu0 %v1914_v17  ;;  %v1948_v40 = vld [vmem:[#allocation4 + $0xe4] ss:$8 sps:$4 sm:$0xff]   ;;  %v1950_v41 = vld [vmem:[#allocation4 + $0xe0] ss:$8 sps:$4 sm:$0xff]   ;;  %v1951_v42 = vld [vmem:[#allocation4 + $0xf4] ss:$8 sps:$4 sm:$0xff]  }
  0x73   : > { %502 = vmatpush1.bf16.msra.mxu1 %v1903_v16  ;;  %952 = vmatprep.subr.bf16.mxu0 %v1915_v18  ;;  %v1953_v43 = vld [vmem:[#allocation4 + $0xf0] ss:$8 sps:$4 sm:$0xff]   ;;  %v1956_v44 = vld [vmem:[#allocation4 + $0x104] ss:$8 sps:$4 sm:$0xff]   ;;  %v2446_v57 = vshrl.u32 %v392_v56, 7  ;;  %vm2194_vm1 = vmmov 0  }
  0x74   : > { %v2002_v45 = vld [vmem:[%s2577_s5 + $0x40] sm:$0xff]   ;;  %v2004_v47 = vld [vmem:[%s2577_s5 + $0x48] sm:$0xff]   ;;  %v2006_v49 = vld [vmem:[%s2577_s5 + $0x50] sm:$0xff]   ;;  %s1589_s26 = sshll.u32 %s2373_s12, 3  ;;  %p2595_p6 = scmp.ne.s32.totalorder %s2587_s20, 0 }
  0x75   : > { %v2003_v46 = vld [vmem:[%s2577_s5] sm:$0xff]   ;;  %1720 = vmatprep.subr.bf16.mxu1 %v2002_v45  ;;  %v2005_v48 = vld [vmem:[%s2577_s5 + $0x8] sm:$0xff]   ;;  %v2007_v50 = vld [vmem:[%s2577_s5 + $0x10] sm:$0xff]   ;;  %v394_v58 = vsub.s32 0, %v2446_v57  ;;  %v398_v60 = vsub.s32 1, %v2446_v57  ;;  %v402_v2 = vsub.s32 2, %v2446_v57 }
  0x76   : > { %1599 = vmatmul.mubr.msk.bf16.vlgmr.msra.gmra.mrb[4].mxu1 %vm452_vm0, %v381_v9  ;;  %953 = vmatpush1.bf16.msra.mxu0 %v1917_v19  ;;  %v2008_v51 = vld [vmem:[%s2577_s5 + $0x58] sm:$0xff]   ;;  %v2010_v53 = vld [vmem:[%s2577_s5 + $0x60] sm:$0xff]   ;;  %v2012_v55 = vld [vmem:[%s2577_s5 + $0x68] sm:$0xff]   ;;  %v406_v4 = vsub.s32 3, %v2446_v57  ;;  %s2525_s28 = scalar_lea.vmem [#allocation6], %s1589_s26   ;;  %s1693_s19 = sshll.u32 (%p2595_p6), %s2264_s13, 1 }
  0x77   : > { %954 = vmatprep.subr.bf16.mxu0 %v1918_v20  ;;  %1721 = vmatpush3.bf16.msra.mxu1 %v2003_v46  ;;  %v2009_v52 = vld [vmem:[%s2577_s5 + $0x18] sm:$0xff]   ;;  %v2011_v54 = vld [vmem:[%s2577_s5 + $0x20] sm:$0xff]   ;;  %v2019_v57 = vld [vmem:[%s2579_s7 + $0x8] sm:$0xff]   ;;  %s1712_s27 = sshll.u32 (%p2595_p6), %s2264_s13, 3  ;;  %s1344_s18 = ssub.s32 (%p2595_p6), 3, %s1693_s19 }
  0x78   : > { %1722 = vmatprep.subr.bf16.mxu1 %v2004_v47  ;;  %v390_v59 = vld [vmem:[%s2574_s2] sm:$0xf]  ;;  %v1959_v18 = vld [vmem:[#allocation4 + $0x114] ss:$8 sps:$4 sm:$0xff]   ;;  %v1981_v45 = vld [vmem:[#allocation4 + $0x190] ss:$8 sps:$4 sm:$0xff]   ;;  %s2535_s12 = scalar_lea.vmem (%p2595_p6), %s2581_s9, %s1712_s27  }
  0x79   : > { %v395_v61 = vrot.slane %v390_v59, %v394_v58  ;;  %v399_v63 = vrot.slane %v390_v59, %v398_v60  ;;  %v403_v11 = vrot.slane %v390_v59, %v402_v2  ;;  %v407_v13 = vrot.slane %v390_v59, %v406_v4  ;;  %v1954_v15 = vld [vmem:[#allocation4 + $0x100] ss:$8 sps:$4 sm:$0xff]   ;;  %v1986_v46 = vld [vmem:[#allocation4 + $0x1a4] ss:$8 sps:$4 sm:$0xff]   ;;  %v2001_v56 = vld [vmem:[#allocation4 + $0x1f4] ss:$8 sps:$4 sm:$0xff]  }
  0x7a   : > { %955 = vmatpush1.bf16.msra.mxu0 %v1920_v21  ;;  %v1984_v47 = vld [vmem:[#allocation4 + $0x1a0] ss:$8 sps:$4 sm:$0xff]   ;;  %v1999_v59 = vld [vmem:[#allocation4 + $0x1f0] ss:$8 sps:$4 sm:$0xff]   ;;  %v2193_v4 = vmov 0.0   ;;  %p1345_p7 = scmp.lt.s32.totalorder (%p2595_p6), %s1344_s18, 2 }
  0x7b   : > { %956 = vmatprep.subr.bf16.mxu0 %v1921_v22  ;;  %1723 = vmatpush3.bf16.msra.mxu1 %v2005_v48  ;;  %v1989_v48 = vld [vmem:[#allocation4 + $0x1b4] ss:$8 sps:$4 sm:$0xff]  }
  0x7c   : > { %1724 = vmatprep.subr.bf16.mxu1 %v2006_v49  ;;  %v1987_v49 = vld [vmem:[#allocation4 + $0x1b0] ss:$8 sps:$4 sm:$0xff]  }
  0x7d   : > { %v2016_v2 = vld [vmem:[%s2577_s5 + $0x78] sm:$0xff]  }
  0x7e   : > { %957 = vmatpush1.bf16.msra.mxu0 %v1923_v23 }
  0x7f   : > { %958 = vmatprep.subr.bf16.mxu0 %v1924_v24  ;;  %1725 = vmatpush3.bf16.msra.mxu1 %v2007_v50  ;;  %v1992_v50 = vld [vmem:[#allocation4 + $0x1c4] ss:$8 sps:$4 sm:$0xff]  }
  0x80   : > { %1726 = vmatprep.subr.bf16.mxu1 %v2008_v51  ;;  %v1990_v51 = vld [vmem:[#allocation4 + $0x1c0] ss:$8 sps:$4 sm:$0xff]  }
  0x82   : > { %959 = vmatpush1.bf16.msra.mxu0 %v1926_v25  ;;  %v1957_v25 = vld [vmem:[#allocation4 + $0x110] ss:$8 sps:$4 sm:$0xff]  }
  0x83   : > { %960 = vmatprep.subr.bf16.mxu0 %v1927_v26  ;;  %1727 = vmatpush3.bf16.msra.mxu1 %v2009_v52  ;;  %v1995_v52 = vld [vmem:[#allocation4 + $0x1d4] ss:$8 sps:$4 sm:$0xff]  }
  0x84   : > { %1728 = vmatprep.subr.bf16.mxu1 %v2010_v53  ;;  %v1993_v53 = vld [vmem:[#allocation4 + $0x1d0] ss:$8 sps:$4 sm:$0xff]  }
  0x86   : > { %961 = vmatpush1.bf16.msra.mxu0 %v1929_v27  ;;  %v1962_v27 = vld [vmem:[#allocation4 + $0x124] ss:$8 sps:$4 sm:$0xff]  }
  0x87   : > { %962 = vmatprep.subr.bf16.mxu0 %v1930_v28  ;;  %1729 = vmatpush3.bf16.msra.mxu1 %v2011_v54  ;;  %v1998_v54 = vld [vmem:[#allocation4 + $0x1e4] ss:$8 sps:$4 sm:$0xff]  }
  0x88   : > { %1730 = vmatprep.subr.bf16.mxu1 %v2012_v55  ;;  %v1996_v55 = vld [vmem:[#allocation4 + $0x1e0] ss:$8 sps:$4 sm:$0xff]  }
  0x8a   : > { %963 = vmatpush1.bf16.msra.mxu0 %v1932_v29 }
  0x8b   : > { %964 = vmatprep.subr.bf16.mxu0 %v1933_v30  ;;  %v1960_v30 = vld [vmem:[#allocation4 + $0x120] ss:$8 sps:$4 sm:$0xff]  }
  0x8e   : > { %965 = vmatpush1.bf16.msra.mxu0 %v1935_v31 }
  0x8f   : > { %966 = vmatprep.subr.bf16.mxu0 %v1936_v32  ;;  %v1965_v32 = vld [vmem:[#allocation4 + $0x134] ss:$8 sps:$4 sm:$0xff]  }
  0x92   : > { %967 = vmatpush1.bf16.msra.mxu0 %v1938_v33  ;;  %v1963_v33 = vld [vmem:[#allocation4 + $0x130] ss:$8 sps:$4 sm:$0xff]  }
  0x93   : > { %968 = vmatprep.subr.bf16.mxu0 %v1939_v34  ;;  %v1968_v34 = vld [vmem:[#allocation4 + $0x144] ss:$8 sps:$4 sm:$0xff]  }
  0x96   : > { %969 = vmatpush1.bf16.msra.mxu0 %v1941_v35  ;;  %v1966_v35 = vld [vmem:[#allocation4 + $0x140] ss:$8 sps:$4 sm:$0xff]  }
  0x97   : > { %970 = vmatprep.subr.bf16.mxu0 %v1942_v36  ;;  %v1971_v36 = vld [vmem:[#allocation4 + $0x154] ss:$8 sps:$4 sm:$0xff]  }
  0x9a   : > { %971 = vmatpush1.bf16.msra.mxu0 %v1944_v37  ;;  %v1969_v37 = vld [vmem:[#allocation4 + $0x150] ss:$8 sps:$4 sm:$0xff]  }
  0x9b   : > { %972 = vmatprep.subr.bf16.mxu0 %v1945_v38  ;;  %v1974_v38 = vld [vmem:[#allocation4 + $0x164] ss:$8 sps:$4 sm:$0xff]  }
  0x9e   : > { %973 = vmatpush1.bf16.msra.mxu0 %v1947_v39  ;;  %v1972_v39 = vld [vmem:[#allocation4 + $0x160] ss:$8 sps:$4 sm:$0xff]  }
  0x9f   : > { %974 = vmatprep.subr.bf16.mxu0 %v1948_v40  ;;  %v1977_v40 = vld [vmem:[#allocation4 + $0x174] ss:$8 sps:$4 sm:$0xff]  }
  0xa2   : > { %975 = vmatpush1.bf16.msra.mxu0 %v1950_v41  ;;  %v1975_v41 = vld [vmem:[#allocation4 + $0x170] ss:$8 sps:$4 sm:$0xff]  }
  0xa3   : > { %976 = vmatprep.subr.bf16.mxu0 %v1951_v42  ;;  %v1980_v42 = vld [vmem:[#allocation4 + $0x184] ss:$8 sps:$4 sm:$0xff]  }
  0xa6   : > { %977 = vmatpush1.bf16.msra.mxu0 %v1953_v43  ;;  %v1978_v43 = vld [vmem:[#allocation4 + $0x180] ss:$8 sps:$4 sm:$0xff]  }
  0xa7   : > { %989 = vmatprep.subr.bf16.mxu0 %v1956_v44  ;;  %v1983_v44 = vld [vmem:[#allocation4 + $0x194] ss:$8 sps:$4 sm:$0xff]  }
 0x141   : > { %v490_v62 = vpop.f32.mrb[0].mxu1 }
 0x142   : > { %v492_v1 = vpop.f32.mrb[1].mxu1  ;;  %v491_v5 = vadd.f32 %v490_v62, %v395_v61  ;;  %v2013_v62 = vld [vmem:[%s2577_s5 + $0x28] sm:$0xff]  }
 0x143   : > { %v494_v3 = vpop.f32.mrb[2].mxu1  ;;  %v493_v8 = vadd.f32 %v492_v1, %v399_v63  ;;  %1731 = vmatpush3.bf16.msra.mxu1 %v2013_v62  ;;  %v2015_v1 = vld [vmem:[%s2577_s5 + $0x30] sm:$0xff]  }
 0x144   : > { %v495_v6 = vadd.f32 %v494_v3, %v395_v61  ;;  %v496_v7 = vpop.f32.mrb[3].mxu1  ;;  %v2017_v3 = vld [vmem:[%s2577_s5 + $0x38] sm:$0xff]  }
 0x145   : > { %v497_v9 = vadd.f32 %v496_v7, %v399_v63  ;;  %v2014_v63 = vld [vmem:[%s2577_s5 + $0x70] sm:$0xff]  }
 0x146   : > { %v542_v10 = vpack.c.bf16 %v495_v6, %v491_v5  ;;  %1732 = vmatprep.subr.bf16.mxu1 %v2014_v63  ;;  %v614_v5 = vld [vmem:[%s2576_s4] sm:$0x3] }
 0x147   : > { %v543_v12 = vpack.c.bf16 %v497_v9, %v493_v8  ;;  %1733 = vmatpush3.bf16.msra.mxu1 %v2015_v1  ;;  %v619_v6 = vrot.slane %v614_v5, %v394_v58  ;;  %v623_v8 = vrot.slane %v614_v5, %v398_v60  ;;  %v2020_v60 = vld [vmem:[%s2579_s7 + $0x10] sm:$0xff]  }
 0x148   : > { %v546_v17 = vmax.bf16 %v2192_v0, %v542_v10  ;;  %1734 = vmatprep.subr.bf16.mxu1 %v2016_v2 }
 0x149   : > { %v547_v14 = vmax.bf16 %v2192_v0, %v543_v12  ;;  %v533_v16 = vpop.f32.mrb[4].mxu1 }
 0x14a   : > { %v2461_v19 = vadd.f32 %v533_v16, %v403_v11  ;;  %v535_v20 = vpop.f32.mrb[5].mxu1 }
 0x14b   : > { %978 = vmatprep.mubr.bf16.mxu0 %v547_v14  ;;  %v536_v21 = vadd.f32 %v535_v20, %v407_v13  ;;  %v537_v22 = vpop.f32.mrb[6].mxu1  ;;  %1735 = vmatpush3.bf16.msra.mxu1 %v2017_v3  ;;  %v2021_v20 = vld [vmem:[%s2579_s7 + $0x18] sm:$0xff]  }
 0x14c   : > { %979 = vmatmul.mubr.bf16.vlgmr.msra.gmra.mrb[0].mxu0 %v546_v17  ;;  %v2463_v23 = vadd.f32 %v537_v22, %v403_v11  ;;  %v539_v24 = vpop.f32.mrb[7].mxu1  ;;  %1751 = vmatprep.subr.bf16.mxu1 %v2193_v4  ;;  %v2023_v22 = vld [vmem:[%s2579_s7 + $0x28] sm:$0xff]  }
 0x14d   : > { %990 = vmatpush1.bf16.msra.mxu0 %v1954_v15  ;;  %v540_v26 = vadd.f32 %v539_v24, %v407_v13  ;;  %v2025_v24 = vld [vmem:[%s2579_s7 + $0x38] sm:$0xff]  }
 0x14e   : > { %991 = vmatprep.subr.bf16.mxu0 %v1959_v18  ;;  %v544_v28 = vpack.c.bf16 %v2463_v23, %v2461_v19  ;;  %v2018_v19 = vld [vmem:[%s2579_s7] sm:$0xff]   ;;  %v2024_v23 = vld [vmem:[%s2579_s7 + $0x30] sm:$0xff]  }
 0x14f   : > { %v545_v29 = vpack.c.bf16 %v540_v26, %v536_v21  ;;  %v2022_v21 = vld [vmem:[%s2579_s7 + $0x20] sm:$0xff]  }
 0x150   : > { %v548_v61 = vmax.bf16 %v2192_v0, %v544_v28 }
 0x151   : > { %992 = vmatpush1.bf16.msra.mxu0 %v1957_v25  ;;  %v549_v31 = vmax.bf16 %v2192_v0, %v545_v29  ;;  %v1664_v29 = vld [vmem:[%s2578_s6] ss:$0 sm:$0xff] }
 0x152   : > { %993 = vmatprep.subr.bf16.mxu0 %v1962_v27 }
 0x153   : > { %1021 = vmatprep.mubr.bf16.mxu0 %v549_v31 }
 0x155   : > { %994 = vmatpush1.bf16.msra.mxu0 %v1960_v30 }
 0x156   : > { %995 = vmatprep.subr.bf16.mxu0 %v1965_v32 }
 0x159   : > { %996 = vmatpush1.bf16.msra.mxu0 %v1963_v33 }
 0x15a   : > { %997 = vmatprep.subr.bf16.mxu0 %v1968_v34 }
 0x15d   : > { %998 = vmatpush1.bf16.msra.mxu0 %v1966_v35 }
 0x15e   : > { %999 = vmatprep.subr.bf16.mxu0 %v1971_v36  ;;  %v1681_v36 = vld [vmem:[%s2580_s8] ss:$0 sm:$0xff] }
 0x161   : > { %1000 = vmatpush1.bf16.msra.mxu0 %v1969_v37 }
 0x162   : > { %1001 = vmatprep.subr.bf16.mxu0 %v1974_v38 }
 0x165   : > { %1002 = vmatpush1.bf16.msra.mxu0 %v1972_v39 }
 0x166   : > { %1003 = vmatprep.subr.bf16.mxu0 %v1977_v40 }
 0x169   : > { %1004 = vmatpush1.bf16.msra.mxu0 %v1975_v41 }
 0x16a   : > { %1005 = vmatprep.subr.bf16.mxu0 %v1980_v42 }
 0x16d   : > { %1006 = vmatpush1.bf16.msra.mxu0 %v1978_v43 }
 0x16e   : > { %1007 = vmatprep.subr.bf16.mxu0 %v1983_v44 }
 0x171   : > { %1008 = vmatpush1.bf16.msra.mxu0 %v1981_v45 }
 0x172   : > { %1009 = vmatprep.subr.bf16.mxu0 %v1986_v46 }
 0x175   : > { %1010 = vmatpush1.bf16.msra.mxu0 %v1984_v47 }
 0x176   : > { %1011 = vmatprep.subr.bf16.mxu0 %v1989_v48 }
 0x179   : > { %1012 = vmatpush1.bf16.msra.mxu0 %v1987_v49 }
 0x17a   : > { %1013 = vmatprep.subr.bf16.mxu0 %v1992_v50 }
 0x17d   : > { %1014 = vmatpush1.bf16.msra.mxu0 %v1990_v51 }
 0x17e   : > { %1015 = vmatprep.subr.bf16.mxu0 %v1995_v52 }
 0x181   : > { %1016 = vmatpush1.bf16.msra.mxu0 %v1993_v53 }
 0x182   : > { %1017 = vmatprep.subr.bf16.mxu0 %v1998_v54 }
 0x185   : > { %1018 = vmatpush1.bf16.msra.mxu0 %v1996_v55 }
 0x186   : > { %1019 = vmatprep.subr.bf16.mxu0 %v2001_v56 }
 0x189   : > { %1020 = vmatpush1.bf16.msra.mxu0 %v1999_v59 }
 0x18c   : > { %1022 = vmatmul.mubr.bf16.vlgmr.msra.gmra.mrb[0].mxu0 %v548_v61 }
 0x25f   : > { %v1023_v7 = vpop.f32.mrb[0].mxu0 }
 0x260   : > { %v1025_v9 = vpop.f32.mrb[1].mxu0  ;;  %v1771_v11 = vadd.f32 %v1023_v7, %v619_v6 }
 0x261   : > { %v1027_v10 = vpop.f32.mrb[2].mxu0  ;;  %v1772_v14 = vadd.f32 %v1025_v9, %v623_v8 }
 0x262   : > { %v1773_v12 = vadd.f32 %v1027_v10, %v619_v6  ;;  %v1029_v13 = vpop.f32.mrb[3].mxu0 }
 0x263   : > { %v1774_v15 = vadd.f32 %v1029_v13, %v623_v8 }
 0x264   : > { %v1032_v16 = vpack.c.bf16 %v1773_v12, %v1771_v11 }
 0x265   : > { %v1033_v17 = vpack.c.bf16 %v1774_v15, %v1772_v14 }
 0x266   : > { %v1034_v58 = vmax.bf16 %v2192_v0, %v1032_v16 }
 0x267   : > { %v1035_v18 = vmax.bf16 %v2192_v0, %v1033_v17 }
 0x269   : > { %1203 = vmatprep.mubr.bf16.mxu1 %v1035_v18 }
 0x26a   : > { %1204 = vmatmul.mubr.bf16.vlgmr.msra.gmra.mrb[8].mxu1 %v1034_v58 }
 0x26b   : > { %1752 = vmatpush3.bf16.msra.mxu1 %v2018_v19  ;;  %1767 = vmatprep.mubr.msk.bf16.mxu1 %vm2194_vm1, %v2193_v4 }
 0x26c   : > { %1753 = vmatprep.subr.bf16.mxu1 %v2193_v4 }
 0x26f   : > { %1754 = vmatpush3.bf16.msra.mxu1 %v2019_v57 }
 0x270   : > { %1755 = vmatprep.subr.bf16.mxu1 %v2193_v4 }
 0x273   : > { %1756 = vmatpush3.bf16.msra.mxu1 %v2020_v60 }
 0x274   : > { %1757 = vmatprep.subr.bf16.mxu1 %v2193_v4 }
 0x277   : > { %1758 = vmatpush3.bf16.msra.mxu1 %v2021_v20 }
 0x278   : > { %1759 = vmatprep.subr.bf16.mxu1 %v2193_v4 }
 0x27b   : > { %1760 = vmatpush3.bf16.msra.mxu1 %v2022_v21 }
 0x27c   : > { %1761 = vmatprep.subr.bf16.mxu1 %v2193_v4 }
 0x27f   : > { %1762 = vmatpush3.bf16.msra.mxu1 %v2023_v22 }
 0x280   : > { %1763 = vmatprep.subr.bf16.mxu1 %v2193_v4 }
 0x283   : > { %1764 = vmatpush3.bf16.msra.mxu1 %v2024_v23 }
 0x284   : > { %1765 = vmatprep.subr.bf16.mxu1 %v2193_v4 }
 0x287   : > { %1766 = vmatpush3.bf16.msra.mxu1 %v2025_v24 }
 0x33d   : > { %v1736_v25 = vpop.f32.mrb[8].mxu1 }
 0x33e   : > { %v1737_v26 = vpop.f32.mrb[9].mxu1 }
 0x33f   : > { %v1738_v27 = vadd.f32 %v1737_v26, %v1736_v25  ;;  %v1739_v28 = vpop.f32.mrb[10].mxu1 }
 0x340   : > { %v1740_v30 = vpop.f32.mrb[11].mxu1 }
 0x341   : > { %v1741_v31 = vadd.f32 %v1740_v30, %v1739_v28  ;;  %v1206_v32 = vadd.f32 %v1738_v27, %v1664_v29 }
 0x343   : > { %v1209_v33 = vadd.f32 %v1741_v31, %v1664_v29 }
 0x345   : > { %v1212_v34 = vpack.c.bf16 %v1209_v33, %v1206_v32 }
 0x347   : > { %v1213_v35 = vmax.bf16 %v2192_v0, %v1212_v34 }
 0x349   : > { %1768 = vmatmul.mubr.bf16.vlgmr.msra.gmra.mrb[12].mxu1 %v1213_v35 }
 0x41c   : > { %v1319_v37 = vpop.f32.mrb[12].mxu1 }
 0x41d   : > { %v1769_v38 = vpop.f32.mrb[13].mxu1  ;;  %v1320_v40 = vadd.f32 %v1681_v36, %v1319_v37  ;;  %1342 = sbr.rel (!%p2595_p6) target bundleno = 1109 (0x455), region = 68 }
 0x41e   : > { %v1322_v39 = vpop.f32.mrb[14].mxu1 }
 0x41f   : > { %v1323_v41 = vadd.f32 %v1681_v36, %v1322_v39  ;;  %v1770_v42 = vpop.f32.mrb[15].mxu1 }
 0x421   : > { %v1718_v43 = vpack.c.bf16 %v1323_v41, %v1320_v40 }
 0x423   : > { %1719 = vst [vmem:[%s2525_s28] sm:$0xff] %v1718_v43  }
 0x424   : > { %s2603_s18 = smov (!%p1345_p7, %s1344_s18), 2 }
 0x425   : > { %s1694_s29 = sshll.u32 %s2603_s18, 6 }
 0x426   : > { %p1697_p9 = scmp.eq.s32.totalorder %s1694_s29, 0 }
 0x427   : > { %s2541_s20 = sshrl.u32 (!%p1697_p9), %s2603_s18, 1 }
 0x428   : > { %1353 = sbr.rel (%p1697_p9) target bundleno = 1109 (0x455), region = 72  ;;  %p1698_p12 = scmp.le.s32.totalorder (!%p1697_p9), %s2541_s20, 0 }
 0x42f   : > { %1519 = sbr.rel (%p1698_p12) target bundleno = 1088 (0x440), region = 150  ;;  %s2154_s13 = smov (!%p1698_p12), %s2535_s12  }
 0x430   : > { %s2158_s15 = smov (!%p1698_p12), %s2525_s28   ;;  %s2162_s24 = smov (!%p1698_p12), 0  }
 0x431   : > { %s2166_s22 = smov (!%p1698_p12), 0  }
 0x436 LB: >> { %v1369_v0 = vld [vmem:[%s2160_s15] sm:$0xf]  ;;  %v1371_v44 = vld [vmem:[%s2160_s15 + $0x4] sm:$0xf]  ;;  %s1373_s21 = sadd.s32 1, %s2164_s24  ;;  %s1363_s22 = sadd.s32 1, %s2168_s22   ;;  %s2168_s22 = sphi %s2166_s22, %s1363_s22   ;;  %s2164_s24 = sphi %s2162_s24, %s2163_s24   ;;  %s2160_s15 = sphi %s2158_s15, %s1378_s15   ;;  %s2156_s13 = sphi %s2154_s13, %s1379_s13  }
 0x437   : >> { %1370 = vst [vmem:[%s2156_s13] sm:$0xf] %v1369_v0  ;;  %1372 = vst [vmem:[%s2156_s13 + $0x4] sm:$0xf] %v1371_v44  ;;  %p1374_p0 = scmp.ge.s32.totalorder %s1373_s21, %s2541_s20  ;;  %p1362_p2 = scmp.ge.s32.totalorder %s1363_s22, %s2541_s20 }
 0x439   : >> { %s2605_s21 = smov (%p1374_p0, %s1373_s21), 0  ;;  %1365 = sbr.rel (!%p1362_p2) target bundleno = 1078 (0x436), region = 156 }
 0x43a   : >> { %s1699_s23 = sshll.u32 %s2605_s21, 3  ;;  %s2163_s24 = smov %s2605_s21  }
 0x43b   : >> { %s1378_s15 = scalar_lea.vmem %s2525_s28, %s1699_s23 [#allocation6]   ;;  %s1379_s13 = scalar_lea.vmem %s2535_s12, %s1699_s23  }
 0x440 PF: > { %s2551_s16 = sand.u32 1, %s2603_s18   ;;  %s1713_s26 = sshll.u32 %s2541_s20, 3 }
 0x441   : > { %s1384_s19 = scalar_lea.vmem %s2525_s28, %s1713_s26 [#allocation6]   ;;  %s1386_s27 = scalar_lea.vmem %s2535_s12, %s1713_s26  }
 0x442   : > { %p1704_p4 = scmp.le.s32.totalorder %s2551_s16, 0 }
 0x443   : > { %s2170_s25 = smov (!%p1704_p4), %s1386_s27   ;;  %s2174_s30 = smov (!%p1704_p4), %s1384_s19  }
 0x444   : > { %1533 = sbr.rel (%p1704_p4) target bundleno = 1109 (0x455), region = 161  ;;  %s2178_s29 = smov (!%p1704_p4), 0  }
 0x445   : > { %s2182_s13 = smov (!%p1704_p4), 0  }
 0x44b LB: >> { %v1396_v45 = vld [vmem:[%s2176_s30] sm:$0xf]  ;;  %s1398_s18 = sadd.s32 1, %s2180_s29  ;;  %s1390_s13 = sadd.s32 1, %s2184_s13   ;;  %s2184_s13 = sphi %s2182_s13, %s1390_s13   ;;  %s2180_s29 = sphi %s2178_s29, %s2179_s29   ;;  %s2176_s30 = sphi %s2174_s30, %s1403_s30   ;;  %s2172_s25 = sphi %s2170_s25, %s1404_s25  }
 0x44c   : >> { %1397 = vst [vmem:[%s2172_s25] sm:$0xf] %v1396_v45  ;;  %p1399_p8 = scmp.ge.s32.totalorder %s1398_s18, %s2551_s16  ;;  %p1389_p10 = scmp.ge.s32.totalorder %s1390_s13, %s2551_s16 }
 0x44e   : >> { %s2607_s18 = smov (%p1399_p8, %s1398_s18), 0  ;;  %1392 = sbr.rel (!%p1389_p10) target bundleno = 1099 (0x44b), region = 167 }
 0x44f   : >> { %s1705_s28 = sshll.u32 %s2607_s18, 2  ;;  %s2179_s29 = smov %s2607_s18  }
 0x450   : >> { %s1403_s30 = scalar_lea.vmem %s1384_s19, %s1705_s28 [#allocation6]   ;;  %s1404_s25 = scalar_lea.vmem %s1386_s27, %s1705_s28  }
 0x455 PF: > { %p20_p13 = scmp.ge.s32.totalorder %s2267_s14, 4   ;;  %s2596_s30 = smov %s2144_s10 }
 0x456   : > { %s2597_s10 = smov %s2148_s11  ;;  %s2598_s11 = smov %s2277_s17 }
 0x457   : > { %s2599_s12 = smov %s2267_s14  ;;  %22 = sbr.rel (!%p20_p13) target bundleno = 4 (0x4), region = 178 }
 0x45e   :  { %1467 = vsyncpa [#allocation3], 1 }
 0x45f   :  { %1469 = vsyncpa [#allocation3 + $0x1], 1 }
 0x460   :  { %1470 = vsyncpa [#allocation5], 1 }

</bundles_post_ra>
